<compile_context>
chip_gen: v6e
topology: v6e:2x2x1
jax: 0.10.0
libtpu: 0.0.40
codegen_flags: <defaults>
</compile_context>

<pallas_src>
import functools

import jax
import jax.numpy as jnp
from jax import lax
from jax.experimental import pallas as pl
from jax.experimental.pallas import tpu as pltpu

LANES = 128
MAX_BLOCK_BYTES = 2 * 1024 * 1024     # per input per pipeline buffer
VMEM_LIMIT_BYTES = 32 * 1024 * 1024   # 2 inputs x 2 buffers x 2 MiB + headroom


def _num_tensorcores():
    """2-way 'parallel' core split only on v7x; v5e/v6e are single-TC."""
    try:
        kind = jax.devices()[0].device_kind.lower()
    except Exception:
        return 1
    return 2 if ("v7" in kind or "7x" in kind) else 1


def _mre_kernel(a_ref, b_ref, out_ref, acc_ref, *,
                epsilon, norm_type, rows, block_rows, steps_per_core,
                acc_rows, any_partial):
    c = pl.program_id(0)   # core-split axis ("parallel", size 1 off v7x)
    j = pl.program_id(1)   # streaming axis ("arbitrary")

    @pl.when(j == 0)
    def _():
        acc_ref[...] = jnp.zeros_like(acc_ref)

    a = a_ref[...].astype(jnp.float32)
    b = b_ref[...].astype(jnp.float32)
    denom = jnp.abs(a) + jnp.abs(b) + epsilon
    # Reciprocal goes to the EUP slot instead of a VALU divide sequence.
    rel = (a - b) * pl.reciprocal(denom, approx=False)

    if norm_type == "L1":
        contrib = jnp.abs(rel)      # sum |x|   (L1 pre-divide)
    else:
        contrib = rel * rel         # sum x^2   (L2 pre-sqrt)

    def _accumulate(x):
        if acc_rows == 8:
            # Sublane-wide accumulator: pure vreg adds, no per-step XLU reduce.
            acc_ref[...] += x.reshape(-1, 8, LANES).sum(axis=0)
        else:
            acc_ref[...] += x.sum(axis=0, keepdims=True)

    if any_partial:
        blk = c * steps_per_core + j                 # unclamped block index
        is_partial = (blk + 1) * block_rows > rows   # partial or duplicate step

        @pl.when(jnp.logical_not(is_partial))
        def _():
            _accumulate(contrib)                     # fast path: no masking

        @pl.when(is_partial)
        def _():
            row0 = blk * block_rows
            row_ids = row0 + lax.broadcasted_iota(jnp.int32, contrib.shape, 0)
            _accumulate(jnp.where(row_ids < rows, contrib, 0.0))
    else:
        _accumulate(contrib)

    @pl.when(j == pl.num_programs(1) - 1)
    def _():
        out_ref[...] = acc_ref[...].reshape(1, acc_rows, LANES)


def mean_relative_error(A, B, *, norm_type="L2", epsilon=1e-12):
    """Pallas TPU implementation of MeanRelativeError.forward."""
    assert A.shape == B.shape
    numel = A.size

    a = A.reshape(-1)              # keep native dtype; cast inside the kernel
    b = B.reshape(-1)

    rows = numel // LANES          # 128-aligned main body
    tail = numel - rows * LANES    # <128 leftover elements

    def _elem_contrib(x, y):
        x = x.astype(jnp.float32)
        y = y.astype(jnp.float32)
        rel = (x - y) / (jnp.abs(x) + jnp.abs(y) + epsilon)
        return jnp.abs(rel) if norm_type == "L1" else rel * rel

    # Unaligned tail: tiny plain-JAX epilogue instead of a full jnp.pad pass.
    if tail:
        tail_sum = jnp.sum(_elem_contrib(a[rows * LANES:], b[rows * LANES:]))
    else:
        tail_sum = jnp.float32(0.0)

    if rows == 0:
        total = tail_sum
    else:
        itemsize = jnp.dtype(A.dtype).itemsize
        max_block_rows = max(8, (MAX_BLOCK_BYTES // (LANES * itemsize)) // 8 * 8)
        num_cores = _num_tensorcores()

        if rows <= max_block_rows:
            if num_cores > 1:
                # v7x small-input case: split the single block across both TCs.
                half = ((pl.cdiv(rows, num_cores) + 7) // 8) * 8
                if half < rows:
                    block_rows = half
                else:
                    num_cores = 1
                    block_rows = rows
            else:
                block_rows = rows
        else:
            block_rows = max_block_rows

        total_blocks = pl.cdiv(rows, block_rows)
        steps_per_core = pl.cdiv(total_blocks, num_cores)
        any_partial = (num_cores * steps_per_core * block_rows) != rows
        acc_rows = 8 if block_rows % 8 == 0 else 1

        a_main = a if tail == 0 else a[:rows * LANES]
        b_main = b if tail == 0 else b[:rows * LANES]
        a2 = a_main.reshape(rows, LANES)
        b2 = b_main.reshape(rows, LANES)

        def in_map(c, j):
            # Clamp so any trailing (fully-masked) duplicate step re-reads a
            # valid block; only possible on the 2-core split with odd blocks.
            return (jnp.minimum(c * steps_per_core + j, total_blocks - 1), 0)

        kernel = functools.partial(
            _mre_kernel, epsilon=epsilon, norm_type=norm_type, rows=rows,
            block_rows=block_rows, steps_per_core=steps_per_core,
            acc_rows=acc_rows, any_partial=any_partial)

        lane_sums = pl.pallas_call(
            kernel,
            out_shape=jax.ShapeDtypeStruct((num_cores, acc_rows, LANES),
                                           jnp.float32),
            grid_spec=pltpu.PrefetchScalarGridSpec(
                num_scalar_prefetch=0,
                grid=(num_cores, steps_per_core),
                in_specs=[
                    pl.BlockSpec((block_rows, LANES), in_map),
                    pl.BlockSpec((block_rows, LANES), in_map),
                ],
                out_specs=pl.BlockSpec((1, acc_rows, LANES),
                                       lambda c, j: (c, 0, 0)),
                scratch_shapes=[pltpu.VMEM((acc_rows, LANES), jnp.float32)],
            ),
            compiler_params=pltpu.CompilerParams(
                dimension_semantics=("parallel", "arbitrary"),
                vmem_limit_bytes=VMEM_LIMIT_BYTES),
        )(a2, b2)

        # Tiny final cross-sublane / cross-lane / cross-core reduction in JAX.
        total = jnp.sum(lane_sums) + tail_sum

    if norm_type == "L1":
        return total / numel                 # ||x||_1 / numel
    return jnp.sqrt(total) / numel           # ||x||_2 / numel


def _reference(A, B, *, norm_type="L2", epsilon=1e-12):
    rel = (A - B) / (jnp.abs(A) + jnp.abs(B) + epsilon)
    if norm_type == "L1":
        return jnp.sum(jnp.abs(rel)) / rel.size
    return jnp.sqrt(jnp.sum(rel * rel)) / rel.size


if __name__ == "__main__":
    key = jax.random.PRNGKey(0)
    ka, kb, kc, kd = jax.random.split(key, 4)

    # NCHW-shaped example inputs, as the PyTorch module would typically see.
    A = jax.random.normal(ka, (2, 4, 16, 16), dtype=jnp.float32)
    B = jax.random.normal(kb, (2, 4, 16, 16), dtype=jnp.float32)

    out_l2 = jax.block_until_ready(mean_relative_error(A, B, norm_type="L2"))
    out_l1 = jax.block_until_ready(mean_relative_error(A, B, norm_type="L1"))
    ref_l2 = _reference(A, B, norm_type="L2")
    ref_l1 = _reference(A, B, norm_type="L1")
    assert jnp.allclose(out_l2, ref_l2, rtol=1e-4, atol=1e-6), (out_l2, ref_l2)
    assert jnp.allclose(out_l1, ref_l1, rtol=1e-4, atol=1e-6), (out_l1, ref_l1)

    # Unaligned numel: exercises the no-pad tail epilogue and acc_rows=1 path.
    C = jax.random.normal(kc, (5, 97), dtype=jnp.float32)
    D = jax.random.normal(kd, (5, 97), dtype=jnp.float32)
    out_u = jax.block_until_ready(mean_relative_error(C, D, norm_type="L2"))
    ref_u = _reference(C, D, norm_type="L2")
    assert jnp.allclose(out_u, ref_u, rtol=1e-4, atol=1e-6), (out_u, ref_u)

    print("KERNEL_OK")
</pallas_src>

<mosaic_0001>
module attributes {stable_mosaic.version = 11 : i64} {
  func.func @_mre_kernel(%arg0: i32, %arg1: i32, %arg2: memref<16x128xf32, #tpu.memory_space<vmem>>, %arg3: memref<16x128xf32, #tpu.memory_space<vmem>>, %arg4: memref<1x8x128xf32, #tpu.memory_space<vmem>>, %arg5: memref<8x128xf32, #tpu.memory_space<vmem>>) attributes {dimension_semantics = [#tpu.dimension_semantics<parallel>, #tpu.dimension_semantics<arbitrary>], iteration_bounds = array<i64: 1, 1>, scalar_prefetch = 0 : i64, scratch_operands = 1 : i64, tpu.core_type = #tpu.core_type<tc>, window_params = [{transform_indices = @transform_0, window_bounds = array<i64: 16, 128>}, {transform_indices = @transform_1, window_bounds = array<i64: 16, 128>}, {transform_indices = @transform_2, window_bounds = array<i64: 1, 8, 128>}]} {
    %c0_i32 = arith.constant 0 : i32
    %0 = arith.cmpi eq, %arg1, %c0_i32 : i32
    %1 = arith.extui %0 : i1 to i32
    %c0_i32_0 = arith.constant 0 : i32
    %2 = arith.cmpi ne, %1, %c0_i32_0 : i32
    scf.if %2 {
      %cst_11 = arith.constant 0.000000e+00 : f32
      %22 = vector.broadcast %cst_11 : f32 to vector<8x128xf32>
      %c0_12 = arith.constant 0 : index
      %c0_13 = arith.constant 0 : index
      %23 = vector.load %arg5[%c0_12, %c0_13] : memref<8x128xf32, #tpu.memory_space<vmem>>, vector<8x128xf32>
      tpu.vector_store %arg5[%c0_12, %c0_13], %22 {strides = array<i32>} : memref<8x128xf32, #tpu.memory_space<vmem>>, vector<8x128xf32>,
    } else {
    }
    %c0 = arith.constant 0 : index
    %c0_1 = arith.constant 0 : index
    %3 = vector.load %arg2[%c0, %c0_1] : memref<16x128xf32, #tpu.memory_space<vmem>>, vector<16x128xf32>
    %c0_2 = arith.constant 0 : index
    %c0_3 = arith.constant 0 : index
    %4 = vector.load %arg3[%c0_2, %c0_3] : memref<16x128xf32, #tpu.memory_space<vmem>>, vector<16x128xf32>
    %5 = math.absf %3 : vector<16x128xf32>
    %6 = math.absf %4 : vector<16x128xf32>
    %7 = arith.addf %5, %6 : vector<16x128xf32>
    %cst = arith.constant 9.99999996E-13 : f32
    %8 = vector.broadcast %cst : f32 to vector<16x128xf32>
    %9 = arith.addf %7, %8 : vector<16x128xf32>
    %10 = arith.subf %3, %4 : vector<16x128xf32>
    %11 = tpu.reciprocal %9 : vector<16x128xf32> -> vector<16x128xf32>
    %12 = arith.mulf %10, %11 : vector<16x128xf32>
    %13 = arith.mulf %12, %12 : vector<16x128xf32>
    %c0_4 = arith.constant 0 : index
    %c0_5 = arith.constant 0 : index
    %14 = vector.load %arg5[%c0_4, %c0_5] : memref<8x128xf32, #tpu.memory_space<vmem>>, vector<8x128xf32>
    %15 = vector.shape_cast %13 : vector<16x128xf32> to vector<2x8x128xf32>
    %cst_6 = arith.constant dense<0.000000e+00> : vector<8x128xf32>
    %16 = vector.multi_reduction <add>, %15, %cst_6 [0] : vector<2x8x128xf32> to vector<8x128xf32>
    %17 = arith.addf %14, %16 : vector<8x128xf32>
    %c0_7 = arith.constant 0 : index
    %c0_8 = arith.constant 0 : index
    %18 = vector.load %arg5[%c0_7, %c0_8] : memref<8x128xf32, #tpu.memory_space<vmem>>, vector<8x128xf32>
    tpu.vector_store %arg5[%c0_7, %c0_8], %17 {strides = array<i32>} : memref<8x128xf32, #tpu.memory_space<vmem>>, vector<8x128xf32>,
    %c0_i32_9 = arith.constant 0 : i32
    %19 = arith.cmpi eq, %arg1, %c0_i32_9 : i32
    %20 = arith.extui %19 : i1 to i32
    %c0_i32_10 = arith.constant 0 : i32
    %21 = arith.cmpi ne, %20, %c0_i32_10 : i32
    scf.if %21 {
      %c0_11 = arith.constant 0 : index
      %c0_12 = arith.constant 0 : index
      %22 = vector.load %arg5[%c0_11, %c0_12] : memref<8x128xf32, #tpu.memory_space<vmem>>, vector<8x128xf32>
      %23 = vector.shape_cast %22 : vector<8x128xf32> to vector<1x8x128xf32>
      %c0_13 = arith.constant 0 : index
      %c0_14 = arith.constant 0 : index
      %c0_15 = arith.constant 0 : index
      %24 = vector.load %arg4[%c0_13, %c0_14, %c0_15] : memref<1x8x128xf32, #tpu.memory_space<vmem>>, vector<1x8x128xf32>
      tpu.vector_store %arg4[%c0_13, %c0_14, %c0_15], %23 {strides = array<i32>} : memref<1x8x128xf32, #tpu.memory_space<vmem>>, vector<1x8x128xf32>,
    } else {
    }
    return
  }
  func.func @transform_0(%arg0: i32, %arg1: i32) -> (i32, i32) {
    %c1_i32 = arith.constant 1 : i32
    %0 = arith.muli %arg0, %c1_i32 : i32
    %1 = arith.addi %0, %arg1 : i32
    %c0_i32 = arith.constant 0 : i32
    %2 = arith.minsi %1, %c0_i32 : i32
    %c0_i32_0 = arith.constant 0 : i32
    %c0_i32_1 = arith.constant 0 : i32
    return %2, %c0_i32_0 : i32, i32
  }
  func.func @transform_1(%arg0: i32, %arg1: i32) -> (i32, i32) {
    %c1_i32 = arith.constant 1 : i32
    %0 = arith.muli %arg0, %c1_i32 : i32
    %1 = arith.addi %0, %arg1 : i32
    %c0_i32 = arith.constant 0 : i32
    %2 = arith.minsi %1, %c0_i32 : i32
    %c0_i32_0 = arith.constant 0 : i32
    %c0_i32_1 = arith.constant 0 : i32
    return %2, %c0_i32_0 : i32, i32
  }
  func.func @transform_2(%arg0: i32, %arg1: i32) -> (i32, i32, i32) {
    %c0_i32 = arith.constant 0 : i32
    %c0_i32_0 = arith.constant 0 : i32
    %c0_i32_1 = arith.constant 0 : i32
    return %arg0, %c0_i32, %c0_i32_0 : i32, i32, i32
  }
}

</mosaic_0001>

<bundles_post_ra>
// kernel: tpu_custom_call.1
= control target key start
LH: loop header
LB: loop body
LE: loop exit
PB: predicated region body
PF: predicated region fallthrough
CT: control target
= control target key end

     0   :  { %7 = vsyncpa [#allocation4], 0  ;;  %s218_s0 = inlined_call_operand.hbm [shape: f32[16,128], index: 0, kind: input, shape index: {}]   ;;  %s219_s1 = inlined_call_operand.hbm [shape: f32[16,128], index: 1, kind: input, shape index: {}]   ;;  %s220_s2 = inlined_call_operand.hbm [shape: f32[1,8,128], index: 2, kind: output, shape index: {}]  }
   0x1   :  { %8 = vsyncpa [#allocation7], 0 }
   0x2   :  { %9 = vsyncpa [#allocation5], 0  ;;  %s189_s9 = smov [#allocation3]  }
   0x3   :  { %s21_s10 = sshll.u32 %s189_s9, 4  ;;  %s22_s10 = int_to_ptr.vmem [resolvable:$true] %s21_s10 }
   0x4   :  { %s131_s11 = scalar_lea.vmem %s22_s10, 256  ;;  %p136_p1 = scmp.lt.s32.totalorder %s22_s10, %s22_s10 }
   0x5   :  { %p132_p0 = scmp.ne.s32.totalorder %s22_s10, %s131_s11  ;;  %p137_p2 = scmp.lt.s32.totalorder %s131_s11, %s131_s11 }
   0x7   :  { %p138_p3 = por %p137_p2, %p136_p1 }
   0x9   :  { %p139_p4 = pnand %p138_p3, %p132_p0 }
   0xb   :  { %142 = shalt.err (!%p139_p4)
}
   0xc   :  { %s190_s12 = smov 128   ;;  %s191_s13 = smov 8  }
   0xd   :  { %27 = dma.hbm_to_vmem [thread:$0]  %s218_s0, 256, %s22_s10, [#allocation4], %s190_s12, %s190_s12, %s191_s13  }
   0xe   :  { %s192_s16 = smov [#allocation6]  }
   0xf   :  { %s39_s17 = sshll.u32 %s192_s16, 4  ;;  %s40_s17 = int_to_ptr.vmem [resolvable:$true] %s39_s17 }
  0x10   :  { %s151_s18 = scalar_lea.vmem %s40_s17, 256  ;;  %p156_p6 = scmp.lt.s32.totalorder %s40_s17, %s40_s17 }
  0x11   :  { %p152_p5 = scmp.ne.s32.totalorder %s40_s17, %s151_s18  ;;  %p157_p7 = scmp.lt.s32.totalorder %s151_s18, %s151_s18 }
  0x13   :  { %p158_p8 = por %p157_p7, %p156_p6 }
  0x15   :  { %p159_p9 = pnand %p158_p8, %p152_p5 }
  0x17   :  { %162 = shalt.err (!%p159_p9)
}
  0x18   :  { %45 = dma.hbm_to_vmem [thread:$0]  %s219_s1, 256, %s40_s17, [#allocation7], %s190_s12, %s190_s12, %s191_s13  }
  0x19   :  { %183 = dma.done.wait [#allocation4], 256  }
  0x1a   :  { %184 = vsyncadd [#allocation4], 4294967040 }
  0x1b   :  { %185 = dma.done.wait [#allocation7], 256  }
  0x1c   :  { %186 = vsyncadd [#allocation7], 4294967040  ;;  %v65_v0 = vld [vmem:[#allocation3] sm:$0xff]  ;;  %v66_v1 = vld [vmem:[#allocation3 + $0x8] sm:$0xff]  ;;  %s193_s0 = smov [#allocation8]  }
  0x1d   :  { %v67_v2 = vld [vmem:[#allocation6] sm:$0xff]  ;;  %v68_v3 = vld [vmem:[#allocation6 + $0x8] sm:$0xff]  ;;  %v69_v4 = vand.u32 2147483647, %v65_v0  ;;  %v70_v5 = vand.u32 2147483647, %v66_v1 }
  0x1e   :  { %v71_v6 = vand.u32 2147483647, %v67_v2  ;;  %v72_v7 = vand.u32 2147483647, %v68_v3  ;;  %v77_v12 = vsub.f32 %v65_v0, %v67_v2  ;;  %v78_v13 = vsub.f32 %v66_v1, %v68_v3  ;;  %s100_s1 = sshll.u32 %s193_s0, 4  ;;  %s101_s1 = int_to_ptr.vmem [resolvable:$true] %s100_s1 }
  0x1f   :  { %s163_s21 = scalar_lea.vmem %s101_s1, 128  ;;  %p168_p11 = scmp.lt.s32.totalorder %s101_s1, %s101_s1 }
  0x20   :  { %v73_v8 = vadd.f32 %v71_v6, %v69_v4  ;;  %v74_v9 = vadd.f32 %v72_v7, %v70_v5  ;;  %p164_p10 = scmp.ne.s32.totalorder %s101_s1, %s163_s21  ;;  %p169_p12 = scmp.lt.s32.totalorder %s163_s21, %s163_s21 }
  0x22   :  { %v75_v10 = vadd.f32 1e-12, %v73_v8  ;;  %v76_v11 = vadd.f32 1e-12, %v74_v9  ;;  %p170_p13 = por %p169_p12, %p168_p11 }
  0x24   :  { %119 = vrcp.f32 %v75_v10  ;;  %p171_p0 = pnand %p170_p13, %p164_p10 }
  0x25   :  { %121 = vrcp.f32 %v76_v11 }
  0x31   :  { %v120_v14 = vpop.eup %119 }
  0x32   :  { %v122_v15 = vpop.eup %121  ;;  %v81_v16 = vmul.f32 %v120_v14, %v77_v12 }
  0x33   :  { %v82_v17 = vmul.f32 %v122_v15, %v78_v13 }
  0x34   :  { %v83_v18 = vmul.f32 %v81_v16, %v81_v16 }
  0x35   :  { %v84_v19 = vmul.f32 %v82_v17, %v82_v17 }
  0x37   :  { %v86_v20 = vadd.f32 %v84_v19, %v83_v18 }
  0x39   :  { %93 = vst [vmem:[#allocation8] sm:$0xff] %v86_v20 }
  0x3a   :  { %174 = shalt.err (!%p171_p0)
}
  0x3b   :  { %103 = dma.vmem_to_hbm [thread:$0]  %s101_s1, 128, %s220_s2, [#allocation5]  }
  0x3c   :  { %187 = dma.done.wait [#allocation5], 128  }
  0x3d   :  { %188 = vsyncadd [#allocation5], 4294967168 }
  0x3e   :  { %107 = vsyncpa [#allocation4], 1 }
  0x3f   :  { %108 = vsyncpa [#allocation7], 1 }
  0x40   :  { %109 = vsyncpa [#allocation5], 1 }

</bundles_post_ra>
